<compile_context>
chip_gen: v7x
topology: tpu7x:2x2x1
jax: 0.10.0
libtpu: 0.0.40
codegen_flags: <defaults>
</compile_context>

<pallas_src>
import functools

import numpy as np
import jax
import jax.numpy as jnp
from jax.experimental import pallas as pl
from jax.experimental.pallas import tpu as pltpu


# ---------------------------------------------------------------------------
# Kernels
# ---------------------------------------------------------------------------

def _router_prob(x, w1_ref, b1_ref, w2_ref, b2_ref, num_out_path):
    """Router MLP (Linear -> ReLU -> Linear) + relu(tanh(.)), f32 math."""
    w1 = w1_ref[...]
    h = jnp.dot(x.astype(w1.dtype), w1,
                preferred_element_type=jnp.float32) + b1_ref[...]
    h = jnp.maximum(h, 0.0)
    w2 = w2_ref[...]                                   # (H, 128-padded): lane-dense MXU op
    logits = jnp.dot(h.astype(w2.dtype), w2,
                     preferred_element_type=jnp.float32)
    logits = logits[:, :num_out_path] + b2_ref[...]    # in-register slice to real width
    return jnp.maximum(jnp.tanh(logits), 0.0)          # activateFunc = relu(tanh(x))


def _router_only_kernel(x_ref, w1_ref, b1_ref, w2_ref, b2_ref, prob_ref):
    # embed_size == pool_out: AdaptiveAvgPool1d is the identity; emb is returned
    # as x in the wrapper, the kernel only computes the router.
    x = x_ref[...]
    prob_ref[...] = _router_prob(x, w1_ref, b1_ref, w2_ref, b2_ref,
                                 prob_ref.shape[-1])


def _router_pool_kernel(x_ref, w1_ref, b1_ref, w2_ref, b2_ref, pool_ref,
                        emb_ref, prob_ref):
    x = x_ref[...]
    prob_ref[...] = _router_prob(x, w1_ref, b1_ref, w2_ref, b2_ref,
                                 prob_ref.shape[-1])
    # AdaptiveAvgPool1d(pool_out) over the embed axis as x @ P (f32 accumulation).
    pool = pool_ref[...]
    emb = jnp.dot(x.astype(pool.dtype), pool, preferred_element_type=jnp.float32)
    emb_ref[...] = emb.astype(emb_ref.dtype)


# ---------------------------------------------------------------------------
# Host-side helpers
# ---------------------------------------------------------------------------

@functools.lru_cache(maxsize=None)
def _pool_matrix_np(L, O):
    """(L, O) matrix P with (x @ P) == AdaptiveAvgPool1d(O)(x) over the last dim."""
    i = np.arange(O)
    start = np.floor(i * L / O).astype(np.int64)
    end = np.ceil((i + 1) * L / O).astype(np.int64)
    k = np.arange(L)[:, None]
    mask = (k >= start[None, :]) & (k < end[None, :])
    counts = (end - start).astype(np.float32)
    return mask.astype(np.float32) / counts[None, :]


def _round_up(x, m):
    return ((x + m - 1) // m) * m


def _vmem_tile_bytes(rows, cols, dtype):
    """Approximate VMEM footprint of one (rows, cols) tile ((8,128) padded)."""
    return (_round_up(max(rows, 1), 8) * _round_up(max(cols, 1), 128)
            * jnp.dtype(dtype).itemsize)


def _vmem_capacity_bytes():
    try:
        return int(pltpu.get_tpu_info().vmem_capacity_bytes)
    except Exception:
        return 64 << 20        # conservative fallback == v7x per-TensorCore VMEM


# ---------------------------------------------------------------------------
# Wrapper
# ---------------------------------------------------------------------------

def average_pooling_cell(x, params, num_out_path, pool_out=1024, tile_m=512,
                         mxu_input_dtype=None):
    """emb, path_prob = AveragePoolingCell(x) with x of shape (B, S, embed_size).

    mxu_input_dtype: optional matmul-operand dtype (e.g. jnp.bfloat16) for f32
    callers (v5e fast path); accumulation stays f32, results pick up ~1e-3 rel
    error.  Note: a bf16 caller runs the matmuls in bf16 and gets a bf16 emb
    (documented perf tradeoff).  path_prob is returned in f32.
    """
    B, S, E = x.shape
    M = B * S
    x2d = x.reshape(M, E)

    w1, b1, w2, b2 = params
    H = w1.shape[1]
    cdt = jnp.dtype(mxu_input_dtype) if mxu_input_dtype is not None else x2d.dtype
    np_pad = _round_up(num_out_path, 128)

    # One-time parameter massaging (single pad/reshape ops; folded under jit).
    w1c = w1.astype(cdt)
    b1r = b1.reshape(1, H).astype(jnp.float32)
    w2p = jnp.pad(w2.astype(cdt), ((0, 0), (0, np_pad - num_out_path)))
    b2r = b2.reshape(1, num_out_path).astype(jnp.float32)

    identity_pool = (E == pool_out)
    if not identity_pool:
        pool_mat = jnp.asarray(_pool_matrix_np(E, pool_out), dtype=cdt)

    # --- VMEM budget & row-tile selection -----------------------------------
    budget = int(0.85 * _vmem_capacity_bytes())
    const_bytes = 2 * (_vmem_tile_bytes(E, H, cdt)
                       + _vmem_tile_bytes(1, H, jnp.float32)
                       + _vmem_tile_bytes(H, np_pad, cdt)
                       + _vmem_tile_bytes(1, num_out_path, jnp.float32))
    if not identity_pool:
        const_bytes += 2 * _vmem_tile_bytes(E, pool_out, cdt)

    def _per_step_bytes(tm):
        b = 2 * _vmem_tile_bytes(tm, E, x2d.dtype)                # x tile (double-buffered)
        b += 2 * _vmem_tile_bytes(tm, num_out_path, jnp.float32)  # prob tile
        b += _vmem_tile_bytes(tm, H, jnp.float32)                 # live h
        b += _vmem_tile_bytes(tm, np_pad, jnp.float32)            # live logits
        if cdt != x2d.dtype:
            b += _vmem_tile_bytes(tm, E, cdt)                     # in-kernel cast of x
        if not identity_pool:
            b += 2 * _vmem_tile_bytes(tm, pool_out, x2d.dtype)    # emb tile (double-buffered)
            b += _vmem_tile_bytes(tm, pool_out, jnp.float32)      # live f32 emb accumulator
        return b

    def _total_bytes(tm):
        return const_bytes + int(1.25 * _per_step_bytes(tm)) + (2 << 20)

    if M <= 8:
        TM = M
    else:
        # >= 4 grid steps so the "parallel" axis shards across both v7x
        # TensorCores and the DMA/compute pipeline always has work to overlap.
        TM = min(tile_m, max(8, _round_up(pl.cdiv(M, 4), 8)))
        while TM > 8 and _total_bytes(TM) > budget:
            TM = max(8, _round_up(TM // 2, 8))
    steps = pl.cdiv(M, TM)
    vmem_limit = int(min(budget, max(_total_bytes(TM), 32 << 20)))

    compiler_params = pltpu.CompilerParams(
        dimension_semantics=("parallel",),
        vmem_limit_bytes=vmem_limit,
    )

    x_spec = pl.BlockSpec((TM, E), lambda i: (i, 0))
    const_specs = [
        pl.BlockSpec((E, H), lambda i: (0, 0)),              # w1 (VMEM-resident)
        pl.BlockSpec((1, H), lambda i: (0, 0)),              # b1
        pl.BlockSpec((H, np_pad), lambda i: (0, 0)),         # w2 (lane-padded)
        pl.BlockSpec((1, num_out_path), lambda i: (0, 0)),   # b2
    ]
    prob_spec = pl.BlockSpec((TM, num_out_path), lambda i: (i, 0))

    if identity_pool:
        prob2d = pl.pallas_call(
            _router_only_kernel,
            out_shape=jax.ShapeDtypeStruct((M, num_out_path), jnp.float32),
            grid_spec=pltpu.PrefetchScalarGridSpec(
                num_scalar_prefetch=0,
                grid=(steps,),
                in_specs=[x_spec] + const_specs,
                out_specs=prob_spec,
            ),
            compiler_params=compiler_params,
        )(x2d, w1c, b1r, w2p, b2r)
        emb = x                     # AdaptiveAvgPool1d(E)(x) == x; zero extra HBM traffic
    else:
        emb2d, prob2d = pl.pallas_call(
            _router_pool_kernel,
            out_shape=(
                jax.ShapeDtypeStruct((M, pool_out), x2d.dtype),
                jax.ShapeDtypeStruct((M, num_out_path), jnp.float32),
            ),
            grid_spec=pltpu.PrefetchScalarGridSpec(
                num_scalar_prefetch=0,
                grid=(steps,),
                in_specs=[x_spec] + const_specs
                         + [pl.BlockSpec((E, pool_out), lambda i: (0, 0))],
                out_specs=(
                    pl.BlockSpec((TM, pool_out), lambda i: (i, 0)),
                    prob_spec,
                ),
            ),
            compiler_params=compiler_params,
        )(x2d, w1c, b1r, w2p, b2r, pool_mat)
        emb = emb2d.reshape(B, S, pool_out)

    path_prob = prob2d.reshape(B, S, num_out_path)
    return emb, path_prob


# ---------------------------------------------------------------------------
# Parameters / reference / test
# ---------------------------------------------------------------------------

def init_params(key, embed_size, hid_router, num_out_path):
    k1, k2, k3 = jax.random.split(key, 3)
    lim1 = 1.0 / jnp.sqrt(embed_size)
    lim2 = 1.0 / jnp.sqrt(hid_router)
    w1 = jax.random.uniform(k1, (embed_size, hid_router), jnp.float32, -lim1, lim1)
    b1 = jax.random.uniform(k2, (hid_router,), jnp.float32, -lim1, lim1)
    w2 = jax.random.uniform(k3, (hid_router, num_out_path), jnp.float32, -lim2, lim2)
    b2 = jnp.full((num_out_path,), 1.5, jnp.float32)   # init_weights(): bias filled with 1.5
    return w1, b1, w2, b2


def _reference(x, params, pool_out=1024):
    w1, b1, w2, b2 = params
    xf = x.astype(jnp.float32)
    h = jnp.maximum(xf @ w1 + b1, 0.0)
    logits = h @ w2 + b2
    prob = jnp.maximum(jnp.tanh(logits), 0.0)
    P = jnp.asarray(_pool_matrix_np(x.shape[-1], pool_out), jnp.float32)
    emb = xf @ P
    return emb, prob


if __name__ == "__main__":
    key = jax.random.PRNGKey(0)
    kx1, kp1, kx2, kp2 = jax.random.split(key, 4)

    B, S = 2, 8
    HID, NPATH = 32, 4

    # 1) Upsample case (embed_size=32 < 1024): dense pooling-matrix path.
    E = 32
    x = jax.random.normal(kx1, (B, S, E), jnp.float32)
    params = init_params(kp1, E, HID, NPATH)
    emb, path_prob = average_pooling_cell(x, params, NPATH)
    jax.block_until_ready((emb, path_prob))
    emb_ref, prob_ref = _reference(x, params)
    assert emb.shape == (B, S, 1024) and path_prob.shape == (B, S, NPATH)
    assert jnp.allclose(emb, emb_ref, atol=2e-5, rtol=2e-5)
    assert jnp.allclose(path_prob, prob_ref, atol=2e-5, rtol=2e-5)

    # 2) Identity case (embed_size=1024): router-only kernel, emb is x itself.
    E2 = 1024
    x2 = jax.random.normal(kx2, (B, S, E2), jnp.float32)
    params2 = init_params(kp2, E2, HID, NPATH)
    emb2, prob2 = average_pooling_cell(x2, params2, NPATH)
    jax.block_until_ready((emb2, prob2))
    _, prob2_ref = _reference(x2, params2)
    assert emb2.shape == (B, S, 1024) and jnp.array_equal(emb2, x2)
    # K=1024 accumulation-order noise between the Pallas and XLA matmuls.
    assert jnp.allclose(prob2, prob2_ref, atol=1e-4, rtol=1e-4)

    # 3) Opt-in bf16 MXU operands (v5e fast path) — looser tolerance by design.
    emb_b, prob_b = average_pooling_cell(x, params, NPATH,
                                         mxu_input_dtype=jnp.bfloat16)
    jax.block_until_ready((emb_b, prob_b))
    assert jnp.allclose(emb_b, emb_ref, atol=3e-2, rtol=3e-2)
    assert jnp.allclose(prob_b, prob_ref, atol=3e-2, rtol=3e-2)

    print("KERNEL_OK")
</pallas_src>

<mosaic_0001>
module attributes {stable_mosaic.version = 11 : i64} {
  func.func @_router_pool_kernel(%arg0: i32, %arg1: memref<8x32xf32, #tpu.memory_space<vmem>>, %arg2: memref<32x32xf32, #tpu.memory_space<vmem>>, %arg3: memref<1x32xf32, #tpu.memory_space<vmem>>, %arg4: memref<32x128xf32, #tpu.memory_space<vmem>>, %arg5: memref<1x4xf32, #tpu.memory_space<vmem>>, %arg6: memref<32x1024xf32, #tpu.memory_space<vmem>>, %arg7: memref<8x1024xf32, #tpu.memory_space<vmem>>, %arg8: memref<8x4xf32, #tpu.memory_space<vmem>>) attributes {dimension_semantics = [#tpu.dimension_semantics<parallel>], iteration_bounds = array<i64: 2>, scalar_prefetch = 0 : i64, scratch_operands = 0 : i64, tpu.core_type = #tpu.core_type<tc>, window_params = [{transform_indices = @transform_0, window_bounds = array<i64: 8, 32>}, {pipeline_mode = #tpu.pipeline_mode<synchronous>, transform_indices = @transform_1, window_bounds = array<i64: 32, 32>}, {pipeline_mode = #tpu.pipeline_mode<synchronous>, transform_indices = @transform_2, window_bounds = array<i64: 1, 32>}, {pipeline_mode = #tpu.pipeline_mode<synchronous>, transform_indices = @transform_3, window_bounds = array<i64: 32, 128>}, {pipeline_mode = #tpu.pipeline_mode<synchronous>, transform_indices = @transform_4, window_bounds = array<i64: 1, 4>}, {pipeline_mode = #tpu.pipeline_mode<synchronous>, transform_indices = @transform_5, window_bounds = array<i64: 32, 1024>}, {transform_indices = @transform_6, window_bounds = array<i64: 8, 1024>}, {transform_indices = @transform_7, window_bounds = array<i64: 8, 4>}]} {
    %c0 = arith.constant 0 : index
    %c0_0 = arith.constant 0 : index
    %0 = vector.load %arg1[%c0, %c0_0] : memref<8x32xf32, #tpu.memory_space<vmem>>, vector<8x32xf32>
    %c0_1 = arith.constant 0 : index
    %c0_2 = arith.constant 0 : index
    %1 = vector.load %arg2[%c0_1, %c0_2] : memref<32x32xf32, #tpu.memory_space<vmem>>, vector<32x32xf32>
    %cst = arith.constant dense<0.000000e+00> : vector<8x32xf32>
    %2 = tpu.matmul %0, %1, %cst {dimension_numbers = #tpu.dot_dimension_numbers<[1], [0], [0], [1], [0, 0, 1, 1], [], []>} : vector<8x32xf32>, vector<32x32xf32>, vector<8x32xf32> -> vector<8x32xf32>
    %c0_3 = arith.constant 0 : index
    %c0_4 = arith.constant 0 : index
    %3 = vector.load %arg3[%c0_3, %c0_4] : memref<1x32xf32, #tpu.memory_space<vmem>>, vector<1x32xf32>
    %4 = vector.broadcast %3 : vector<1x32xf32> to vector<8x32xf32>
    %5 = arith.addf %2, %4 : vector<8x32xf32>
    %cst_5 = arith.constant 0.000000e+00 : f32
    %6 = vector.broadcast %cst_5 : f32 to vector<8x32xf32>
    %7 = arith.maximumf %5, %6 : vector<8x32xf32>
    %c0_6 = arith.constant 0 : index
    %c0_7 = arith.constant 0 : index
    %8 = vector.load %arg4[%c0_6, %c0_7] : memref<32x128xf32, #tpu.memory_space<vmem>>, vector<32x128xf32>
    %cst_8 = arith.constant dense<0.000000e+00> : vector<8x128xf32>
    %9 = tpu.matmul %7, %8, %cst_8 {dimension_numbers = #tpu.dot_dimension_numbers<[1], [0], [0], [1], [0, 0, 1, 1], [], []>} : vector<8x32xf32>, vector<32x128xf32>, vector<8x128xf32> -> vector<8x128xf32>
    %10 = vector.extract_strided_slice %9 {offsets = [0, 0], sizes = [8, 4], strides = [1, 1]} : vector<8x128xf32> to vector<8x4xf32>
    %c0_9 = arith.constant 0 : index
    %c0_10 = arith.constant 0 : index
    %11 = vector.load %arg5[%c0_9, %c0_10] : memref<1x4xf32, #tpu.memory_space<vmem>>, vector<1x4xf32>
    %12 = vector.broadcast %11 : vector<1x4xf32> to vector<8x4xf32>
    %13 = arith.addf %10, %12 : vector<8x4xf32>
    %14 = math.tanh %13 : vector<8x4xf32>
    %cst_11 = arith.constant 0.000000e+00 : f32
    %15 = vector.broadcast %cst_11 : f32 to vector<8x4xf32>
    %16 = arith.maximumf %14, %15 : vector<8x4xf32>
    %c0_12 = arith.constant 0 : index
    %c0_13 = arith.constant 0 : index
    %17 = vector.load %arg8[%c0_12, %c0_13] : memref<8x4xf32, #tpu.memory_space<vmem>>, vector<8x4xf32>
    tpu.vector_store %arg8[%c0_12, %c0_13], %16 {strides = array<i32>} : memref<8x4xf32, #tpu.memory_space<vmem>>, vector<8x4xf32>,
    %c0_14 = arith.constant 0 : index
    %c0_15 = arith.constant 0 : index
    %18 = vector.load %arg6[%c0_14, %c0_15] : memref<32x1024xf32, #tpu.memory_space<vmem>>, vector<32x1024xf32>
    %cst_16 = arith.constant dense<0.000000e+00> : vector<8x1024xf32>
    %19 = tpu.matmul %0, %18, %cst_16 {dimension_numbers = #tpu.dot_dimension_numbers<[1], [0], [0], [1], [0, 0, 1, 1], [], []>} : vector<8x32xf32>, vector<32x1024xf32>, vector<8x1024xf32> -> vector<8x1024xf32>
    %c0_17 = arith.constant 0 : index
    %c0_18 = arith.constant 0 : index
    %20 = vector.load %arg7[%c0_17, %c0_18] : memref<8x1024xf32, #tpu.memory_space<vmem>>, vector<8x1024xf32>
    tpu.vector_store %arg7[%c0_17, %c0_18], %19 {strides = array<i32>} : memref<8x1024xf32, #tpu.memory_space<vmem>>, vector<8x1024xf32>,
    return
  }
  func.func @transform_0(%arg0: i32) -> (i32, i32) {
    %c0_i32 = arith.constant 0 : i32
    %c0_i32_0 = arith.constant 0 : i32
    return %arg0, %c0_i32 : i32, i32
  }
  func.func @transform_1(%arg0: i32) -> (i32, i32) {
    %c0_i32 = arith.constant 0 : i32
    %c0_i32_0 = arith.constant 0 : i32
    %c0_i32_1 = arith.constant 0 : i32
    return %c0_i32, %c0_i32_0 : i32, i32
  }
  func.func @transform_2(%arg0: i32) -> (i32, i32) {
    %c0_i32 = arith.constant 0 : i32
    %c0_i32_0 = arith.constant 0 : i32
    %c0_i32_1 = arith.constant 0 : i32
    return %c0_i32, %c0_i32_0 : i32, i32
  }
  func.func @transform_3(%arg0: i32) -> (i32, i32) {
    %c0_i32 = arith.constant 0 : i32
    %c0_i32_0 = arith.constant 0 : i32
    %c0_i32_1 = arith.constant 0 : i32
    return %c0_i32, %c0_i32_0 : i32, i32
  }
  func.func @transform_4(%arg0: i32) -> (i32, i32) {
    %c0_i32 = arith.constant 0 : i32
    %c0_i32_0 = arith.constant 0 : i32
    %c0_i32_1 = arith.constant 0 : i32
    return %c0_i32, %c0_i32_0 : i32, i32
  }
  func.func @transform_5(%arg0: i32) -> (i32, i32) {
    %c0_i32 = arith.constant 0 : i32
    %c0_i32_0 = arith.constant 0 : i32
    %c0_i32_1 = arith.constant 0 : i32
    return %c0_i32, %c0_i32_0 : i32, i32
  }
  func.func @transform_6(%arg0: i32) -> (i32, i32) {
    %c0_i32 = arith.constant 0 : i32
    %c0_i32_0 = arith.constant 0 : i32
    return %arg0, %c0_i32 : i32, i32
  }
  func.func @transform_7(%arg0: i32) -> (i32, i32) {
    %c0_i32 = arith.constant 0 : i32
    %c0_i32_0 = arith.constant 0 : i32
    return %arg0, %c0_i32 : i32, i32
  }
}

</mosaic_0001>

<bundles_post_ra>
// kernel: tpu_custom_call.1
= control target key start
LH: loop header
LB: loop body
LE: loop exit
PB: predicated region body
PF: predicated region fallthrough
CT: control target
= control target key end

     0   :  { %13 = vsyncpa [#allocation3], 0  ;;  %s1723_s0 = inlined_call_operand.hbm [shape: f32[16,32], index: 0, kind: input, shape index: {}]   ;;  %s1724_s1 = inlined_call_operand.hbm [shape: f32[32,32], index: 1, kind: input, shape index: {}]   ;;  %s1725_s2 = inlined_call_operand.vmem [shape: f32[1,32], index: 2, kind: input, shape index: {}]   ;;  %s1726_s3 = inlined_call_operand.hbm [shape: f32[32,128], index: 3, kind: input, shape index: {}]   ;;  %s1727_s4 = inlined_call_operand.vmem [shape: f32[1,4], index: 4, kind: input, shape index: {}]   ;;  %s1728_s5 = inlined_call_operand.hbm [shape: f32[32,1024], index: 5, kind: input, shape index: {}]   ;;  %s1729_s6 = inlined_call_operand.hbm [shape: f32[16,1024], index: 6, kind: output, shape index: {0}]   ;;  %s1730_s7 = inlined_call_operand.vmem [shape: f32[16,4], index: 7, kind: output, shape index: {1}]  }
   0x1   :  { %15 = vsyncpa [#allocation3 + $0x1], 0 }
   0x2   :  { %16 = vsyncpa [#allocation6], 0 }
   0x3   :  { %17 = vsyncpa [#allocation9], 0 }
   0x4   :  { %18 = vsyncpa [#allocation4], 0 }
   0x5   :  { %20 = vsyncpa [#allocation4 + $0x1], 0  ;;  %s1427_s24 = smov 0   ;;  %s1429_s25 = smov 0  }
   0x6   :  { %s1431_s26 = smov 0   ;;  %s1433_s27 = smov 0  }
   0x7 LB: > { %s1448_s28 = sadd.s32 4294967295, %s1373_s27   ;;  %s994_s29 = sadd.s32 4294967294, %s1373_s27   ;;  %s1373_s27 = sphi %s1433_s27, %s1756_s27   ;;  %s1369_s26 = sphi %s1431_s26, %s1755_s26   ;;  %s1365_s25 = sphi %s1429_s25, %s1754_s25   ;;  %s1361_s24 = sphi %s1427_s24, %s1753_s24  }
   0x8   : > { %p46_p0 = scmp.ne.s32.totalorder %s1365_s25, %s1361_s24  ;;  %p1731_p1 = scmp.eq.s32.totalorder %s1448_s28, 0 }
   0x9   : > { %p181_p3 = scmp.eq.s32.totalorder %s994_s29, 1  ;;  %p995_p5 = scmp.ge.s32.totalorder %s1373_s27, 1 }
   0xa   : > { %p1457_p4 = por %p1731_p1, %p46_p0  ;;  %p214_p7 = scmp.lt.s32.totalorder %s1373_s27, 3 }
   0xb   : > { %p1462_p6 = por %p181_p3, %p46_p0  ;;  %s1375_s10 = smov [#allocation5]  }
   0xc   : > { %s1735_s30 = scalar_select %p1457_p4, 1, 0 }
   0xd   : > { %s1736_s8 = scalar_select %p1462_p6, 1, 0 }
   0xe   : > { %p1467_p8 = pnand %p995_p5, %p214_p7  ;;  %s226_s11 = sshll.u32 %s1375_s10, 4  ;;  %s1471_s11 = int_to_ptr.vmem [resolvable:$true] %s226_s11 }
   0xf   : > { %1737 = sst [smem:[#allocation15_spill]] %s1736_s8  ;;  %s1376_s13 = smov [#allocation7]  }
  0x10   : > { %s1738_s9 = scalar_select %p1467_p8, 1, 0 }
  0x11   : > { %p1115_p9 = pneg %p1467_p8  ;;  %s242_s14 = sshll.u32 %s1376_s13, 4  ;;  %s1482_s14 = int_to_ptr.vmem [resolvable:$true] %s242_s14 }
  0x12   : > { %s1377_s15 = smov [#allocation8]   ;;  %s1185_s19 = scalar_lea.hbm %s1724_s1, 512 }
  0x13   : > { %p1478_p11 = pnand %p1115_p9, %p1731_p1  ;;  %s1484_s16 = sshll.u32 %s1377_s15, 4  ;;  %s259_s16 = int_to_ptr.vmem [resolvable:$true] %s1484_s16 }
  0x14   : > { %p1186_p12 = scmp.ne.s32.totalorder %s1724_s1, %s1185_s19  ;;  %p1192_p5 = scmp.lt.u32.totalorder %s1185_s19, %s1724_s1 }
  0x15   : > { %p1494_p13 = pneg %p1478_p11 }
  0x17   : > { %p1188_p0 = pnand %p1494_p13, %p1186_p12 }
  0x19   : > { %p1189_p3 = pneg %p1188_p0 }
  0x1b   : > { %p1194_p7 = pnand %p1192_p5, %p1189_p3 }
  0x1d   : > { %1197 = shalt.err (!%p1194_p7)
}
  0x1e   : > { %s1198_s10 = scalar_lea.vmem %s1471_s11, 512  ;;  %p1206_p2 = scmp.lt.s32.totalorder %s1471_s11, %s1471_s11 }
  0x1f   : > { %p1199_p9 = scmp.ne.s32.totalorder %s1471_s11, %s1198_s10  ;;  %p1207_p6 = scmp.lt.s32.totalorder %s1198_s10, %s1198_s10 }
  0x21   : > { %p1201_p10 = pnand %p1199_p9, %p1494_p13  ;;  %p1208_p12 = por %p1207_p6, %p1206_p2 }
  0x23   : > { %p1202_p1 = pneg %p1201_p10 }
  0x25   : > { %p1209_p0 = pnand %p1208_p12, %p1202_p1 }
  0x27   : > { %1212 = shalt.err (!%p1209_p0)
}
  0x28   : > { %s1378_s13 = smov 128   ;;  %s1379_s15 = smov 8  }
  0x29   : > { %1118 = dma.hbm_to_vmem [thread:$0]  (!%p1478_p11), %s1724_s1, 512, %s1471_s11, [#allocation6], %s1378_s13, %s1378_s13, %s1379_s15  }
  0x2a   : > { %s1213_s21 = scalar_lea.hbm %s1726_s3, 512 }
  0x2b   : > { %p1214_p2 = scmp.ne.s32.totalorder %s1726_s3, %s1213_s21  ;;  %p1220_p10 = scmp.lt.u32.totalorder %s1213_s21, %s1726_s3 }
  0x2d   : > { %p1216_p1 = pnand %p1214_p2, %p1494_p13 }
  0x2f   : > { %p1217_p6 = pneg %p1216_p1 }
  0x31   : > { %p1222_p3 = pnand %p1220_p10, %p1217_p6 }
  0x33   : > { %1225 = shalt.err (!%p1222_p3)
}
  0x34   : > { %s1226_s11 = scalar_lea.vmem %s1482_s14, 512  ;;  %p1234_p12 = scmp.lt.s32.totalorder %s1482_s14, %s1482_s14 }
  0x35   : > { %p1227_p5 = scmp.ne.s32.totalorder %s1482_s14, %s1226_s11  ;;  %p1235_p0 = scmp.lt.s32.totalorder %s1226_s11, %s1226_s11 }
  0x37   : > { %p1229_p7 = pnand %p1227_p5, %p1494_p13  ;;  %p1236_p2 = por %p1235_p0, %p1234_p12 }
  0x39   : > { %p1230_p9 = pneg %p1229_p7 }
  0x3b   : > { %p1237_p1 = pnand %p1236_p2, %p1230_p9 }
  0x3d   : > { %1240 = shalt.err (!%p1237_p1)
}
  0x3e   : > { %1121 = dma.hbm_to_vmem [thread:$0]  (!%p1478_p11), %s1726_s3, 512, %s1482_s14, [#allocation6], %s1378_s13, %s1378_s13, %s1379_s15  }
  0x3f   : > { %s1241_s20 = scalar_lea.hbm %s1728_s5, 4096 }
  0x40   : > { %p1242_p6 = scmp.ne.s32.totalorder %s1728_s5, %s1241_s20  ;;  %p1248_p5 = scmp.lt.u32.totalorder %s1241_s20, %s1728_s5 }
  0x42   : > { %p1244_p10 = pnand %p1242_p6, %p1494_p13 }
  0x44   : > { %p1245_p3 = pneg %p1244_p10 }
  0x46   : > { %p1250_p7 = pnand %p1248_p5, %p1245_p3 }
  0x48   : > { %1253 = shalt.err (!%p1250_p7)
}
  0x49   : > { %s1254_s11 = scalar_lea.vmem %s259_s16, 4096  ;;  %p1262_p2 = scmp.lt.s32.totalorder %s259_s16, %s259_s16 }
  0x4a   : > { %p1255_p9 = scmp.ne.s32.totalorder %s259_s16, %s1254_s11  ;;  %p1263_p1 = scmp.lt.s32.totalorder %s1254_s11, %s1254_s11 }
  0x4c   : > { %p1257_p12 = pnand %p1255_p9, %p1494_p13  ;;  %p1264_p4 = por %p1263_p1, %p1262_p2 }
  0x4e   : > { %p1258_p0 = pneg %p1257_p12 }
  0x50   : > { %p1265_p8 = pnand %p1264_p4, %p1258_p0 }
  0x52   : > { %1268 = shalt.err (!%p1265_p8)
}
  0x53   : > { %s1380_s14 = smov 1024   ;;  %s1381_s22 = smov 64  }
  0x54   : > { %1124 = dma.hbm_to_vmem [thread:$0]  (!%p1478_p11), %s1728_s5, 4096, %s259_s16, [#allocation9], %s1380_s14, %s1380_s14, %s1381_s22  }
  0x55   : > { %s1558_s8 = sadd.s32 1, %s1373_s27   ;;  %s33_s18 = sadd.s32 1, %s1369_s26 }
  0x56   : > { %s30_s17 = ssub.s32 %s1373_s27, %s1558_s8  ;;  %p40_p8 = scmp.ne.s32.totalorder %s1369_s26, %s1365_s25 }
  0x57   : > { %p31_p4 = scmp.eq.s32.totalorder %s30_s17, 0  ;;  %p41_p13 = scmp.eq.s32.totalorder %s1373_s27, 0 }
  0x58   : > { %p1136_p6 = scmp.lt.s32.totalorder %s1373_s27, 2  ;;  %p1741_p3 = scmp.eq.s32.totalorder %s1448_s28, 1 }
  0x59   : > { %s1568_s19 = scalar_select %p31_p4, %s1369_s26, %s33_s18  }
  0x5a   : > { %p42_p10 = por %p41_p13, %p40_p8  ;;  %p1572_p5 = por %p1741_p3, %p40_p8 }
  0x5b   : > { %s272_s12 = sand.u32 1, %s1369_s26   ;;  %s1001_s21 = sshll.u32 %s1373_s27, 7 }
  0x5c   : > { %s1000_s16 = sshll.u32 %s272_s12, 3  ;;  %s1581_s10 = scalar_lea.hbm %s1723_s0, %s1001_s21 }
  0x5d   : > { %s276_s11 = scalar_lea.vmem [#allocation2], %s1000_s16  ;;  %p1583_p11 = pnand %p1136_p6, %p42_p10 }
  0x5e   : > { %s283_s14 = sshll.u32 %s276_s11, 4  ;;  %s273_s13 = scalar_lea.sflag [#allocation3], %s272_s12  ;;  %s1587_s14 = int_to_ptr.vmem [resolvable:$true] %s283_s14 }
  0x5f   : > { %s1269_s15 = scalar_lea.hbm %s1581_s10, 128  ;;  %p1271_p9 = pneg %p1583_p11 }
  0x60   : > { %p1270_p7 = scmp.ne.s32.totalorder %s1581_s10, %s1269_s15  ;;  %s1274_s21 = scalar_lea.hbm %s1723_s0, 256 }
  0x61   : > { %p1275_p2 = scmp.lt.u32.totalorder %s1581_s10, %s1723_s0  ;;  %p1276_p1 = scmp.lt.u32.totalorder %s1274_s21, %s1269_s15 }
  0x62   : > { %p1272_p12 = pnand %p1271_p9, %p1270_p7  ;;  %p1278_p8 = scmp.lt.u32.totalorder %s1269_s15, %s1581_s10 }
  0x63   : > { %p1277_p4 = por %p1276_p1, %p1275_p2 }
  0x64   : > { %p1273_p0 = pneg %p1272_p12 }
  0x65   : > { %p1279_p13 = por %p1278_p8, %p1277_p4 }
  0x67   : > { %p1280_p6 = pnand %p1279_p13, %p1273_p0 }
  0x69   : > { %1283 = shalt.err (!%p1280_p6)
}
  0x6a   : > { %s1284_s12 = scalar_lea.vmem %s1587_s14, 128  ;;  %s1382_s29 = smov [#allocation2]  }
  0x6b   : > { %p1285_p10 = scmp.ne.s32.totalorder %s1587_s14, %s1284_s12  ;;  %s1289_s11 = sshll.u32 %s1382_s29, 4  ;;  %s1290_s11 = int_to_ptr.vmem [resolvable:$false] %s1289_s11 }
  0x6c   : > { %s1291_s17 = scalar_lea.vmem %s1290_s11, 256  ;;  %p1292_p12 = scmp.lt.s32.totalorder %s1587_s14, %s1290_s11 }
  0x6d   : > { %p1287_p3 = pnand %p1285_p10, %p1271_p9  ;;  %p1293_p2 = scmp.lt.s32.totalorder %s1291_s17, %s1284_s12 }
  0x6f   : > { %p1288_p7 = pneg %p1287_p3  ;;  %p1294_p1 = por %p1293_p2, %p1292_p12 }
  0x71   : > { %p1295_p4 = pnand %p1294_p1, %p1288_p7 }
  0x73   : > { %1298 = shalt.err (!%p1295_p4)
}
  0x74   : > { %1128 = dma.hbm_to_vmem [thread:$0]  (!%p1583_p11), %s1581_s10, 128, %s1587_s14, %s273_s13  }
  0x75   : > { %p1744_p0 = scmp.ne.s32.totalorder %s1738_s9, 0 }
  0x76   : > { %s1617_s15 = sand.u32 (!%p1744_p0), 1, %s1365_s25   ;;  %p1745_p9 = scmp.ne.s32.totalorder (!%p1744_p0), %s1735_s30, 0 }
  0x77   : > { %292 = sbr.rel (%p1744_p0) target bundleno = 602 (0x25a), region = 44  ;;  %s1003_s18 = sshll.u32 (!%p1744_p0), %s1617_s15, 3 }
  0x78   : > { %s295_s21 = scalar_lea.sflag (!%p1744_p0), [#allocation3], %s1617_s15  ;;  %s298_s16 = scalar_lea.vmem (!%p1744_p0), [#allocation2], %s1003_s18 }
  0x7e   : > { %1344 = dma.done.wait (%p1745_p9), %s295_s21, 128  }
  0x7f   : > { %1346 = vsyncadd (%p1745_p9), %s295_s21, 4294967168  ;;  %p1746_p8 = scmp.eq.s32.totalorder %s1448_s28, 0 }
  0x81   : > { %1348 = dma.done.wait (%p1746_p8), [#allocation6], 1024   ;;  %p1747_p11 = pmov %p1746_p8 }
  0x82   : > { %p1748_p13 = pmov %p1746_p8 }
  0x83   : > { %1350 = vsyncadd (%p1747_p11), [#allocation6], 4294966272 }
  0x84   : > { %1352 = dma.done.wait (%p1748_p13), [#allocation9], 4096   ;;  %p1749_p6 = pmov %p1746_p8 }
  0x85   : > { %v1383_v0 = vmov 0.0|0.0   ;;  %vm1384_vm0 = vmmov 0   ;;  %v1385_v1 = vmov 0.0   ;;  %v350_v2 = vld [vmem:[#allocation5] sm:$0xff]  ;;  %v351_v3 = vld [vmem:[#allocation5 + $0x8] sm:$0xff]  ;;  %v352_v4 = vld [vmem:[#allocation5 + $0x10] sm:$0xff] }
  0x86   : > { %1354 = vsyncadd (%p1749_p6), [#allocation9], 4294963200  ;;  %1055 = vmatprep.subr.bf16.mxu0 %v1383_v0  ;;  %1041 = vmatprep.mubr.msk.f32.mxu0 %vm1384_vm0, %v1385_v1  ;;  %v1056_v5 = vpack.c.bf16 %v351_v3, %v350_v2  ;;  %v353_v6 = vld [vmem:[#allocation5 + $0x18] sm:$0xff]  ;;  %v436_v7 = vld [vmem:[#allocation7] sm:$0xff]  ;;  %vm361_vm1 = vcmask 261120   ;;  %s1007_s10 = sshll.u32 %s1617_s15, 6 }
  0x87   : > { %1061 = vmatprep.subr.bf16.mxu1 %v1383_v0  ;;  %1052 = vmatprep.mubr.msk.f32.mxu1 %vm1384_vm0, %v1385_v1  ;;  %v437_v8 = vld [vmem:[#allocation7 + $0x8] sm:$0xff]  ;;  %v1059_v9 = vpack.c.bf16 %v353_v6, %v352_v4  ;;  %v1635_v11 = vld [vmem:[%s298_s16] sm:$0xff]  ;;  %v525_v18 = vld [vmem:[#allocation8] sm:$0xff]  ;;  %s1656_s14 = scalar_lea.vmem [#allocation10], %s1007_s10  ;;  %p345_p10 = scmp.lt.s32.totalorder %s1448_s28, 1  ;;  %vm523_vm2 = vcmask 31744  }
  0x88   : > { %1057 = vmatpush3.bf16.msra.mxu0 %v1056_v5  ;;  %v1062_v10 = vpack.c.bf16 %v437_v8, %v436_v7  ;;  %v438_v12 = vld [vmem:[#allocation7 + $0x10] sm:$0xff]  ;;  %v439_v13 = vld [vmem:[#allocation7 + $0x18] sm:$0xff]  ;;  %v526_v15 = vld [vmem:[#allocation8 + $0x8] sm:$0xff]  ;;  %s1022_s18 = sshll.u32 %s1448_s28, 10  ;;  %s868_s21 = sshll.u32 %s1656_s14, 4  ;;  %s1679_s21 = int_to_ptr.vmem [resolvable:$true] %s868_s21 }
  0x89   : > { %1058 = vmatprep.subr.bf16.mxu0 %v1383_v0  ;;  %v1065_v14 = vpack.c.bf16 %v439_v13, %v438_v12  ;;  %v534_v16 = vld [vmem:[#allocation8 + $0x48] sm:$0xff]  ;;  %v533_v19 = vld [vmem:[#allocation8 + $0x40] sm:$0xff]  ;;  %v528_v20 = vld [vmem:[#allocation8 + $0x18] sm:$0xff]  ;;  %s346_s23 = scalar_select %p345_p10, %s1448_s28, 1 }
  0x8a   : > { %1063 = vmatpush3.bf16.msra.mxu1 %v1062_v10  ;;  %v1067_v17 = vpack.c.bf16 %v534_v16, %v526_v15  ;;  %v1069_v21 = vpack.c.bf16 %v533_v19, %v525_v18  ;;  %v536_v22 = vld [vmem:[#allocation8 + $0x58] sm:$0xff]  ;;  %v542_v24 = vld [vmem:[#allocation8 + $0x88] sm:$0xff]  ;;  %v541_v27 = vld [vmem:[#allocation8 + $0x80] sm:$0xff]  ;;  %s1677_s9 = scalar_lea.hbm %s1729_s6, %s1022_s18  ;;  %s850_s10 = scalar_lea.sflag [#allocation4], %s1617_s15 }
  0x8b   : > { %1064 = vmatprep.subr.bf16.mxu1 %v1383_v0  ;;  %v1075_v23 = vpack.c.bf16 %v536_v22, %v528_v20  ;;  %v550_v25 = vld [vmem:[#allocation8 + $0xc8] sm:$0xff]  ;;  %v549_v28 = vld [vmem:[#allocation8 + $0xc0] sm:$0xff]  ;;  %v1009_v42 = vld [vmem:[%s1725_s2] ss:$0 sm:$0xff]  ;;  %s1008_s12 = sshll.u32 %s346_s23, 3  ;;  %s1299_s22 = scalar_lea.vmem %s1679_s21, 1024 }
  0x8c   : > { %1060 = vmatpush3.bf16.msra.mxu0 %v1059_v9  ;;  %v1071_v26 = vpack.c.bf16 %v550_v25, %v542_v24  ;;  %v1073_v29 = vpack.c.bf16 %v549_v28, %v541_v27  ;;  %v530_v30 = vld [vmem:[#allocation8 + $0x28] sm:$0xff]  ;;  %v529_v33 = vld [vmem:[#allocation8 + $0x20] sm:$0xff]  ;;  %v527_v43 = vld [vmem:[#allocation8 + $0x10] sm:$0xff]  ;;  %s348_s17 = scalar_lea.vmem %s1730_s7, %s1008_s12  ;;  %p1300_p3 = scmp.ne.s32.totalorder %s1679_s21, %s1299_s22 }
  0x8d   : > { %1068 = vmatprep.subr.bf16.mxu0 %v1067_v17  ;;  %v538_v31 = vld [vmem:[#allocation8 + $0x68] sm:$0xff]  ;;  %v537_v34 = vld [vmem:[#allocation8 + $0x60] sm:$0xff]  ;;  %v535_v44 = vld [vmem:[#allocation8 + $0x50] sm:$0xff]  ;;  %s1386_s28 = smov [#allocation10]  }
  0x8e   : > { %1066 = vmatpush3.bf16.msra.mxu1 %v1065_v14  ;;  %v1083_v32 = vpack.c.bf16 %v538_v31, %v530_v30  ;;  %v1085_v35 = vpack.c.bf16 %v537_v34, %v529_v33  ;;  %v546_v36 = vld [vmem:[#allocation8 + $0xa8] sm:$0xff]  ;;  %v545_v39 = vld [vmem:[#allocation8 + $0xa0] sm:$0xff]  ;;  %v544_v46 = vld [vmem:[#allocation8 + $0x98] sm:$0xff]  ;;  %v1077_v50 = vpack.c.bf16 %v535_v44, %v527_v43  ;;  %p1301_p7 = pnand %p1300_p3, %p1572_p5  ;;  %s1303_s13 = sshll.u32 %s1386_s28, 4  ;;  %s1304_s13 = int_to_ptr.vmem [resolvable:$false] %s1303_s13 }
  0x8f   : > { %1042 = vmatmul.mubr.msk.f32.vlgmr.msra.gmra.mrb[0].mxu0 %vm361_vm1, %v1635_v11  ;;  %1076 = vmatprep.subr.bf16.mxu1 %v1075_v23  ;;  %v554_v37 = vld [vmem:[#allocation8 + $0xe8] sm:$0xff]  ;;  %v553_v40 = vld [vmem:[#allocation8 + $0xe0] sm:$0xff]  ;;  %v552_v47 = vld [vmem:[#allocation8 + $0xd8] sm:$0xff]  ;;  %s1305_s23 = scalar_lea.vmem %s1304_s13, 2048  ;;  %p1306_p2 = scmp.lt.s32.totalorder %s1679_s21, %s1304_s13 }
  0x90   : > { %621 = vmatprep.mubr.f32.mxu0 %v1385_v1  ;;  %1070 = vmatpush1.bf16.msra.mxu0 %v1069_v21  ;;  %v1087_v38 = vpack.c.bf16 %v554_v37, %v546_v36  ;;  %v1089_v41 = vpack.c.bf16 %v553_v40, %v545_v39  ;;  %v1079_v52 = vpack.c.bf16 %v552_v47, %v544_v46  ;;  %v543_v53 = vld [vmem:[#allocation8 + $0x90] sm:$0xff]  ;;  %v532_v55 = vld [vmem:[#allocation8 + $0x38] sm:$0xff]  ;;  %p1302_p12 = pneg %p1301_p7  ;;  %p1307_p1 = scmp.lt.s32.totalorder %s1305_s23, %s1299_s22 }
  0x91   : > { %1072 = vmatprep.subr.bf16.mxu0 %v1071_v26  ;;  %v551_v54 = vld [vmem:[#allocation8 + $0xd0] sm:$0xff]  ;;  %v540_v56 = vld [vmem:[#allocation8 + $0x78] sm:$0xff] }
  0x92   : > { %v1081_v57 = vpack.c.bf16 %v551_v54, %v543_v53  ;;  %v1091_v58 = vpack.c.bf16 %v540_v56, %v532_v55  ;;  %v531_v59 = vld [vmem:[#allocation8 + $0x30] sm:$0xff]  ;;  %v548_v61 = vld [vmem:[#allocation8 + $0xb8] sm:$0xff]  ;;  %p1308_p4 = por %p1307_p1, %p1306_p2 }
  0x93   : > { %v539_v60 = vld [vmem:[#allocation8 + $0x70] sm:$0xff]  ;;  %v556_v62 = vld [vmem:[#allocation8 + $0xf8] sm:$0xff] }
  0x94   : > { %1074 = vmatpush1.bf16.msra.mxu0 %v1073_v29  ;;  %v1093_v63 = vpack.c.bf16 %v539_v60, %v531_v59  ;;  %v1095_v0 = vpack.c.bf16 %v556_v62, %v548_v61  ;;  %v547_v2 = vld [vmem:[#allocation8 + $0xb0] sm:$0xff]  ;;  %p1309_p0 = pnand %p1308_p4, %p1302_p12 }
  0x95   : > { %1084 = vmatprep.subr.bf16.mxu0 %v1083_v32  ;;  %v555_v3 = vld [vmem:[#allocation8 + $0xf0] sm:$0xff] }
  0x96   : > { %v1097_v4 = vpack.c.bf16 %v555_v3, %v547_v2  ;;  %v1012_v8 = vld [vmem:[%s1727_s4] ss:$0 sm:$0xff] }
  0x97   : > { %1013 = vmatmul.mubr.msk.f32.vlgmr.msra.gmra.mrb[2].mxu0 %vm361_vm1, %v1635_v11 }
  0x98   : > { %1086 = vmatpush1.bf16.msra.mxu0 %v1085_v35  ;;  %763 = vmatprep.mubr.f32.mxu0 %v1385_v1 }
  0x99   : > { %1088 = vmatprep.subr.bf16.mxu0 %v1087_v38 }
  0x9c   : > { %1090 = vmatpush1.bf16.msra.mxu0 %v1089_v41 }
  0x9f   : > { %1015 = vmatmul.mubr.msk.f32.vlgmr.msra.gmra.mrb[4].mxu0 %vm361_vm1, %v1635_v11 }
 0x162   : > { %v431_v45 = vpop.f32.mrb[0].mxu0 }
 0x163   : > { %v432_v48 = vadd.f32 %v1009_v42, %v431_v45  ;;  %v1043_v49 = vpop.f32.mrb[1].mxu0 }
 0x165   : > { %v435_v51 = vmax.f32 %v432_v48, 0.0 }
 0x167   : > { %1053 = vmatmul.mubr.msk.f32.vlgmr.msra.gmra.mrb[0].mxu1 %vm361_vm1, %v435_v51 }
 0x168   : > { %1078 = vmatpush1.bf16.msra.mxu1 %v1077_v50  ;;  %692 = vmatprep.mubr.f32.mxu1 %v1385_v1 }
 0x169   : > { %1080 = vmatprep.subr.bf16.mxu1 %v1079_v52 }
 0x16a   : > { %v623_v5 = vpop.f32.mrb[2].mxu0 }
 0x16b   : > { %v625_v6 = vpop.f32.mrb[3].mxu0  ;;  %841 = vst [vmem:[%s1656_s14] sm:$0xff] %v623_v5 }
 0x16c   : > { %1082 = vmatpush1.bf16.msra.mxu1 %v1081_v57  ;;  %842 = vst [vmem:[%s1656_s14 + $0x8] sm:$0xff] %v625_v6 }
 0x16d   : > { %1092 = vmatprep.subr.bf16.mxu1 %v1091_v58 }
 0x16f   : > { %1014 = vmatmul.mubr.msk.f32.vlgmr.msra.gmra.mrb[2].mxu1 %vm361_vm1, %v1635_v11 }
 0x170   : > { %1094 = vmatpush1.bf16.msra.mxu1 %v1093_v63  ;;  %834 = vmatprep.mubr.f32.mxu1 %v1385_v1 }
 0x171   : > { %1096 = vmatprep.subr.bf16.mxu1 %v1095_v0 }
 0x172   : > { %v765_v1 = vpop.f32.mrb[4].mxu0 }
 0x173   : > { %845 = vst [vmem:[%s1656_s14 + $0x20] sm:$0xff] %v765_v1  ;;  %v767_v7 = vpop.f32.mrb[5].mxu0 }
 0x174   : > { %1098 = vmatpush1.bf16.msra.mxu1 %v1097_v4  ;;  %846 = vst [vmem:[%s1656_s14 + $0x28] sm:$0xff] %v767_v7 }
 0x177   : > { %1016 = vmatmul.mubr.msk.f32.vlgmr.msra.gmra.mrb[4].mxu1 %vm361_vm1, %v1635_v11 }
 0x23a   : > { %v509_v9 = vpop.f32.mrb[0].mxu1 }
 0x23b   : > { %v520_v10 = vadd.f32 %v1012_v8, %v509_v9  ;;  %v1054_v11 = vpop.f32.mrb[1].mxu1 }
 0x23d   : > { %1183 = vtanh.f32 %v520_v10 }
 0x242   : > { %v694_v12 = vpop.f32.mrb[2].mxu1 }
 0x243   : > { %843 = vst [vmem:[%s1656_s14 + $0x10] sm:$0xff] %v694_v12  ;;  %v696_v13 = vpop.f32.mrb[3].mxu1 }
 0x244   : > { %844 = vst [vmem:[%s1656_s14 + $0x18] sm:$0xff] %v696_v13 }
 0x247   : > { %v1184_v14 = vpop.eup %1183 }
 0x248   : > { %v522_v15 = vmax.f32 %v1184_v14, 0.0 }
 0x24a   : > { %524 = vst.msk [vmem:[%s348_s17] sm:$0xff] %vm523_vm2, %v522_v15  ;;  %v836_v16 = vpop.f32.mrb[4].mxu1 }
 0x24b   : > { %847 = vst [vmem:[%s1656_s14 + $0x30] sm:$0xff] %v836_v16  ;;  %v838_v17 = vpop.f32.mrb[5].mxu1 }
 0x24c   : > { %848 = vst [vmem:[%s1656_s14 + $0x38] sm:$0xff] %v838_v17 }
 0x24d   : > { %1312 = shalt.err (!%p1309_p0)
}
 0x24e   : > { %s1313_s15 = scalar_lea.hbm %s1677_s9, 1024  ;;  %s1317_s29 = scalar_lea.hbm %s1729_s6, 2048 }
 0x24f   : > { %p1314_p9 = scmp.ne.s32.totalorder %s1677_s9, %s1313_s15  ;;  %p1318_p13 = scmp.lt.u32.totalorder %s1677_s9, %s1729_s6 }
 0x250   : > { %p1319_p6 = scmp.lt.u32.totalorder %s1317_s29, %s1313_s15  ;;  %p1321_p3 = scmp.lt.u32.totalorder %s1313_s15, %s1677_s9 }
 0x251   : > { %p1315_p8 = pnand %p1314_p9, %p1572_p5 }
 0x252   : > { %p1320_p10 = por %p1319_p6, %p1318_p13 }
 0x253   : > { %p1316_p11 = pneg %p1315_p8 }
 0x254   : > { %p1322_p7 = por %p1321_p3, %p1320_p10 }
 0x256   : > { %p1323_p12 = pnand %p1322_p7, %p1316_p11 }
 0x258   : > { %1326 = shalt.err (!%p1323_p12)
}
 0x259   : > { %1113 = dma.vmem_to_hbm [thread:$0]  (%p1572_p5), %s1679_s21, 1024, %s1677_s9, %s850_s10  }
 0x25a PF: > { %s1750_s18 = sld [smem:[#allocation15_spill]]  ;;  %s883_s16 = sand.u32 1, %s1361_s24  }
 0x25b   : > { %p1752_p1 = scmp.ge.s32.totalorder %s1373_s27, 2  ;;  %s884_s30 = scalar_lea.sflag [#allocation4], %s883_s16 }
 0x260   : > { %p1751_p2 = scmp.ne.s32.totalorder %s1750_s18, 0 }
 0x262   : > { %p1130_p4 = pnand %p1752_p1, %p1751_p2 }
 0x264   : > { %1356 = dma.done.wait (!%p1130_p4), %s884_s30, 1024  }
 0x265   : > { %1358 = vsyncadd (!%p1130_p4), %s884_s30, 4294966272  ;;  %p23_p0 = scmp.ge.s32.totalorder %s1558_s8, 4   ;;  %s1753_s24 = smov %s1365_s25 }
 0x266   : > { %s1754_s25 = smov %s1369_s26  ;;  %s1755_s26 = smov %s1568_s19 }
 0x267   : > { %s1756_s27 = smov %s1558_s8  ;;  %25 = sbr.rel (!%p23_p0) target bundleno = 7 (0x7), region = 113 }
 0x26e   :  { %896 = vsyncpa [#allocation3], 1 }
 0x26f   :  { %898 = vsyncpa [#allocation3 + $0x1], 1 }
 0x270   :  { %899 = vsyncpa [#allocation6], 1 }
 0x271   :  { %900 = vsyncpa [#allocation9], 1 }
 0x272   :  { %901 = vsyncpa [#allocation4], 1 }
 0x273   :  { %903 = vsyncpa [#allocation4 + $0x1], 1 }

</bundles_post_ra>
